<compile_context>
chip_gen: v5e
topology: v5e:2x2
jax: 0.10.0
libtpu: 0.0.40
codegen_flags: <defaults>
</compile_context>

<pallas_src>
import functools

import jax
import jax.numpy as jnp
import numpy as np
from jax.experimental import pallas as pl
from jax.experimental.pallas import tpu as pltpu


def _largest_divisor_leq(n, cap):
    for v in range(min(n, cap), 0, -1):
        if n % v == 0:
            return v
    return n


# ---------------------------------------------------------------------------
# Pallas kernels
# ---------------------------------------------------------------------------

def _lstm_chunk_kernel(xp_ref, whh_ref, out_ref, h_scr, c_scr, *,
                       tc, hidden, matmul_dtype):
    """Recurrent part of one LSTM direction over one time chunk.

    Grid = (direction, time_chunk); direction is "parallel", time is "arbitrary".
    xp_ref : (tc, B, 4H) precomputed x @ W_ih + (b_ih + b_hh) for this chunk.  The
             backward direction already gets the mirrored chunk via the index_map.
    whh_ref: (H, 4H)     recurrent weights of this direction (time-invariant).
    out_ref: (tc, B, H)  hidden states for this chunk.
    h_scr/c_scr: (B, H)  recurrent state carried across chunks in VMEM scratch.
    """
    d = pl.program_id(0)          # 0 = forward, 1 = backward
    c = pl.program_id(1)          # chunk index along the recurrence

    @pl.when(c == 0)
    def _():
        h_scr[...] = jnp.zeros_like(h_scr)
        c_scr[...] = jnp.zeros_like(c_scr)

    whh = whh_ref[...]
    H = hidden

    def step(i, carry):
        h, c_state = carry
        # forward walks the chunk 0..tc-1; backward walks it tc-1..0
        rel = jnp.where(d == 1, tc - 1 - i, i)
        gates = xp_ref[rel] + jnp.dot(h.astype(matmul_dtype), whh,
                                      preferred_element_type=jnp.float32)
        # TODO(synk): at production sizes make H a multiple of 128 (or use a (4, H)
        # gate layout) so these slices fall on lane-tile boundaries.
        i_g = jax.nn.sigmoid(gates[:, 0 * H:1 * H])
        f_g = jax.nn.sigmoid(gates[:, 1 * H:2 * H])
        g_g = jnp.tanh(gates[:, 2 * H:3 * H])
        o_g = jax.nn.sigmoid(gates[:, 3 * H:4 * H])
        c_new = f_g * c_state + i_g * g_g
        h_new = o_g * jnp.tanh(c_new)
        out_ref[rel] = h_new
        return h_new, c_new

    h_fin, c_fin = jax.lax.fori_loop(0, tc, step,
                                     (h_scr[...], c_scr[...]), unroll=True)
    h_scr[...] = h_fin
    c_scr[...] = c_fin


def _ln_residual_kernel(x_ref, y_ref, gamma_ref, beta_ref, out_ref):
    """out = LayerNorm(x + y) over the last (feature) axis, eps=1e-5, affine."""
    z = x_ref[...] + y_ref[...]
    mean = jnp.mean(z, axis=-1, keepdims=True)
    var = jnp.mean(jnp.square(z - mean), axis=-1, keepdims=True)
    zn = (z - mean) * jax.lax.rsqrt(var + 1e-5)
    out_ref[...] = zn * gamma_ref[...] + beta_ref[...]


# ---------------------------------------------------------------------------
# Wrappers
# ---------------------------------------------------------------------------

def lstm_recurrence(xp, whh_stack, *, matmul_dtype=jnp.float32):
    """Run both LSTM directions of one layer over the sequence.

    xp        : (2, T, B, 4H) f32, precomputed input projections + biases, time-major.
                Index 0 = forward-direction weights, 1 = backward-direction weights.
    whh_stack : (2, H, 4H) recurrent weights.
    returns   : (2, T, B, H) hidden states (backward already in original time order).
    """
    _, T, B, G = xp.shape
    H = whh_stack.shape[1]
    tc = _largest_divisor_leq(T, 16)       # time-chunk length
    nc = T // tc

    whh_stack = whh_stack.astype(matmul_dtype)

    kernel = functools.partial(_lstm_chunk_kernel, tc=tc, hidden=H,
                               matmul_dtype=matmul_dtype)

    # Chunk selection: forward reads chunk c, backward reads chunk nc-1-c.
    def t_sel(d, c):
        return c + d * (nc - 1 - 2 * c)

    return pl.pallas_call(
        kernel,
        out_shape=jax.ShapeDtypeStruct((2, T, B, H), jnp.float32),
        grid_spec=pltpu.PrefetchScalarGridSpec(
            num_scalar_prefetch=0,
            grid=(2, nc),
            in_specs=[
                pl.BlockSpec((None, tc, B, G),
                             lambda d, c: (d, t_sel(d, c), 0, 0)),
                # Time-invariant weights: same block index across the whole time
                # grid, so they are only re-DMA'd when the direction changes.
                # TODO(synk): on v7x consider pipeline_mode=pl.Buffered(1) here to
                # avoid double-buffering weights in the smaller 64 MiB VMEM.
                pl.BlockSpec((None, H, G), lambda d, c: (d, 0, 0)),
            ],
            out_specs=pl.BlockSpec((None, tc, B, H),
                                   lambda d, c: (d, t_sel(d, c), 0, 0)),
            scratch_shapes=[
                pltpu.VMEM((B, H), jnp.float32),   # h state
                pltpu.VMEM((B, H), jnp.float32),   # c state
            ],
        ),
        compiler_params=pltpu.CompilerParams(
            dimension_semantics=("parallel", "arbitrary")),
    )(xp, whh_stack)


def layer_norm_residual(x_btd, y_btd, gamma, beta):
    """LayerNorm(x + y) over the feature axis, tiled over B*T rows."""
    B, T, D = x_btd.shape
    rows = B * T
    x2 = x_btd.reshape(rows, D)
    y2 = y_btd.reshape(rows, D)
    rt = _largest_divisor_leq(rows, 256)

    out = pl.pallas_call(
        _ln_residual_kernel,
        out_shape=jax.ShapeDtypeStruct((rows, D), jnp.float32),
        grid_spec=pltpu.PrefetchScalarGridSpec(
            num_scalar_prefetch=0,
            grid=(rows // rt,),
            in_specs=[
                pl.BlockSpec((rt, D), lambda i: (i, 0)),
                pl.BlockSpec((rt, D), lambda i: (i, 0)),
                pl.BlockSpec((1, D), lambda i: (0, 0)),
                pl.BlockSpec((1, D), lambda i: (0, 0)),
            ],
            out_specs=pl.BlockSpec((rt, D), lambda i: (i, 0)),
        ),
        compiler_params=pltpu.CompilerParams(
            dimension_semantics=("parallel",)),
    )(x2, y2, gamma.reshape(1, D), beta.reshape(1, D))
    return out.reshape(B, T, D)


def bilstm_with_residual(x, params, matmul_dtype=jnp.float32):
    """Full forward: 2-layer bidirectional LSTM -> residual add -> LayerNorm.

    x: (B, T, input_size) with input_size == hidden_size (required for residual).
    TODO(synk): dropout is a no-op here (eval-mode semantics); training-mode dropout
    between LSTM layers / on lstm_out is not implemented.
    """
    B, T, D = x.shape
    h_stacked = None                       # (2, T, B, H): 0 = fwd, 1 = bwd
    for li, layer in enumerate(params["lstm_layers"]):
        wih_f, whh_f, b_f = layer["fwd"]
        wih_b, whh_b, b_b = layer["bwd"]
        H = whh_f.shape[0]
        wih_stack = jnp.stack([wih_f, wih_b], axis=0)     # (2, d_in, 4H)
        whh_stack = jnp.stack([whh_f, whh_b], axis=0)     # (2, H, 4H)
        b_stack = jnp.stack([b_f, b_b], axis=0)           # (2, 4H)

        if li == 0:
            # One big GEMM over all timesteps for both directions.
            xp = jnp.einsum("btd,sdg->stbg", x, wih_stack)
        else:
            # Fold the fwd/bwd concat of the previous layer into the projection:
            # rows 0..H-1 of W_ih multiply fwd features, rows H..2H-1 bwd features.
            wsplit = wih_stack.reshape(2, 2, H, 4 * H)     # (s, p, H, 4H)
            xp = jnp.einsum("ptbh,sphg->stbg", h_stacked, wsplit)
        xp = xp + b_stack[:, None, None, :]                # fold bias in once

        h_stacked = lstm_recurrence(xp, whh_stack, matmul_dtype=matmul_dtype)

    # Single combine at the end of the network (no per-layer transpose/flip/concat):
    # (2, T, B, H) -> (B, T, 2H) with fwd features first, then bwd.
    lstm_out = jnp.transpose(h_stacked, (2, 1, 0, 3)).reshape(B, T, -1)
    return layer_norm_residual(x, lstm_out, params["ln_gamma"], params["ln_beta"])


# ---------------------------------------------------------------------------
# Deterministic parameter init (PyTorch-style uniform(-1/sqrt(H), 1/sqrt(H)))
# ---------------------------------------------------------------------------

def init_params(key, input_size, hidden_size, num_layers=2):
    H = hidden_size // 2
    scale = 1.0 / np.sqrt(H)
    layers = []
    for layer in range(num_layers):
        d_in = input_size if layer == 0 else 2 * H
        layer_params = {}
        for name in ("fwd", "bwd"):
            key, k1, k2, k3 = jax.random.split(key, 4)
            wih = jax.random.uniform(k1, (d_in, 4 * H), jnp.float32, -scale, scale)
            whh = jax.random.uniform(k2, (H, 4 * H), jnp.float32, -scale, scale)
            b = jax.random.uniform(k3, (4 * H,), jnp.float32, -scale, scale)
            layer_params[name] = (wih, whh, b)     # b represents b_ih + b_hh
        layers.append(layer_params)
    return {
        "lstm_layers": layers,
        "ln_gamma": jnp.ones((hidden_size,), jnp.float32),
        "ln_beta": jnp.zeros((hidden_size,), jnp.float32),
    }


# ---------------------------------------------------------------------------
# Pure-JAX reference (for correctness check)
# ---------------------------------------------------------------------------

def _lstm_dir_ref(x_tbd, wih, whh, b):
    T, B, D = x_tbd.shape
    H = whh.shape[0]

    def step(carry, x_t):
        h, c = carry
        gates = x_t @ wih + h @ whh + b
        i = jax.nn.sigmoid(gates[:, :H])
        f = jax.nn.sigmoid(gates[:, H:2 * H])
        g = jnp.tanh(gates[:, 2 * H:3 * H])
        o = jax.nn.sigmoid(gates[:, 3 * H:])
        c = f * c + i * g
        h = o * jnp.tanh(c)
        return (h, c), h

    init = (jnp.zeros((B, H), jnp.float32), jnp.zeros((B, H), jnp.float32))
    _, hs = jax.lax.scan(step, init, x_tbd)
    return hs


def reference_forward(x, params):
    h = x
    for layer in params["lstm_layers"]:
        x_tbd = jnp.transpose(h, (1, 0, 2))
        hf = _lstm_dir_ref(x_tbd, *layer["fwd"])
        hb = jnp.flip(_lstm_dir_ref(jnp.flip(x_tbd, axis=0), *layer["bwd"]), axis=0)
        h = jnp.transpose(jnp.concatenate([hf, hb], axis=-1), (1, 0, 2))
    z = x + h
    mean = jnp.mean(z, axis=-1, keepdims=True)
    var = jnp.mean((z - mean) ** 2, axis=-1, keepdims=True)
    zn = (z - mean) / jnp.sqrt(var + 1e-5)
    return zn * params["ln_gamma"] + params["ln_beta"]


# ---------------------------------------------------------------------------
# Main
# ---------------------------------------------------------------------------

if __name__ == "__main__":
    B, T = 2, 8
    hidden_size = 32
    input_size = hidden_size            # required: residual x + lstm_out

    key = jax.random.PRNGKey(0)
    key, kx = jax.random.split(key)
    x = jax.random.normal(kx, (B, T, input_size), jnp.float32)

    params = init_params(key, input_size, hidden_size, num_layers=2)

    out = bilstm_with_residual(x, params)
    out = jax.block_until_ready(out)

    ref = jax.block_until_ready(reference_forward(x, params))
    np.testing.assert_allclose(np.asarray(out), np.asarray(ref),
                               rtol=1e-4, atol=1e-4)

    assert out.shape == (B, T, hidden_size)
    print("KERNEL_OK")
</pallas_src>

<mosaic_0001>
module attributes {stable_mosaic.version = 11 : i64} {
  func.func @_lstm_chunk_kernel(%arg0: i32, %arg1: i32, %arg2: memref<1x8x2x64xf32, #tpu.memory_space<vmem>>, %arg3: memref<1x16x64xf32, #tpu.memory_space<vmem>>, %arg4: memref<1x8x2x16xf32, #tpu.memory_space<vmem>>, %arg5: memref<2x16xf32, #tpu.memory_space<vmem>>, %arg6: memref<2x16xf32, #tpu.memory_space<vmem>>) attributes {dimension_semantics = [#tpu.dimension_semantics<parallel>, #tpu.dimension_semantics<arbitrary>], iteration_bounds = array<i64: 2, 1>, scalar_prefetch = 0 : i64, scratch_operands = 2 : i64, tpu.core_type = #tpu.core_type<tc>, window_params = [{transform_indices = @transform_0, window_bounds = array<i64: 1, 8, 2, 64>}, {transform_indices = @transform_1, window_bounds = array<i64: 1, 16, 64>}, {transform_indices = @transform_2, window_bounds = array<i64: 1, 8, 2, 16>}]} {
    %c0_i32 = arith.constant 0 : i32
    %0 = arith.cmpi eq, %arg1, %c0_i32 : i32
    %1 = arith.extui %0 : i1 to i32
    %c0_i32_0 = arith.constant 0 : i32
    %2 = arith.cmpi ne, %1, %c0_i32_0 : i32
    scf.if %2 {
      %cst_107 = arith.constant 0.000000e+00 : f32
      %305 = vector.broadcast %cst_107 : f32 to vector<2x16xf32>
      %c0_108 = arith.constant 0 : index
      %c0_109 = arith.constant 0 : index
      %306 = vector.load %arg5[%c0_108, %c0_109] : memref<2x16xf32, #tpu.memory_space<vmem>>, vector<2x16xf32>
      tpu.vector_store %arg5[%c0_108, %c0_109], %305 {strides = array<i32>} : memref<2x16xf32, #tpu.memory_space<vmem>>, vector<2x16xf32>,
      %cst_110 = arith.constant 0.000000e+00 : f32
      %307 = vector.broadcast %cst_110 : f32 to vector<2x16xf32>
      %c0_111 = arith.constant 0 : index
      %c0_112 = arith.constant 0 : index
      %308 = vector.load %arg6[%c0_111, %c0_112] : memref<2x16xf32, #tpu.memory_space<vmem>>, vector<2x16xf32>
      tpu.vector_store %arg6[%c0_111, %c0_112], %307 {strides = array<i32>} : memref<2x16xf32, #tpu.memory_space<vmem>>, vector<2x16xf32>,
    } else {
    }
    %c0 = arith.constant 0 : index
    %c0_1 = arith.constant 0 : index
    %c0_2 = arith.constant 0 : index
    %3 = vector.load %arg3[%c0, %c0_1, %c0_2] : memref<1x16x64xf32, #tpu.memory_space<vmem>>, vector<1x16x64xf32>
    %4 = vector.shape_cast %3 : vector<1x16x64xf32> to vector<16x64xf32>
    %c0_3 = arith.constant 0 : index
    %c0_4 = arith.constant 0 : index
    %5 = vector.load %arg5[%c0_3, %c0_4] : memref<2x16xf32, #tpu.memory_space<vmem>>, vector<2x16xf32>
    %c0_5 = arith.constant 0 : index
    %c0_6 = arith.constant 0 : index
    %6 = vector.load %arg6[%c0_5, %c0_6] : memref<2x16xf32, #tpu.memory_space<vmem>>, vector<2x16xf32>
    %c0_i32_7 = arith.constant 0 : i32
    %c1_i32 = arith.constant 1 : i32
    %7 = arith.cmpi eq, %arg0, %c1_i32 : i32
    %c7_i32 = arith.constant 7 : i32
    %8 = arith.subi %c7_i32, %c0_i32_7 : i32
    %9 = arith.select %7, %8, %c0_i32_7 : i32
    %c0_8 = arith.constant 0 : index
    %10 = arith.index_cast %9 : i32 to index
    %c0_9 = arith.constant 0 : index
    %c0_10 = arith.constant 0 : index
    %11 = vector.load %arg2[%c0_8, %10, %c0_9, %c0_10] : memref<1x8x2x64xf32, #tpu.memory_space<vmem>>, vector<1x1x2x64xf32>
    %12 = vector.shape_cast %11 : vector<1x1x2x64xf32> to vector<2x64xf32>
    %cst = arith.constant dense<0.000000e+00> : vector<2x64xf32>
    %13 = tpu.matmul %5, %4, %cst {dimension_numbers = #tpu.dot_dimension_numbers<[1], [0], [0], [1], [0, 0, 1, 1], [], []>} : vector<2x16xf32>, vector<16x64xf32>, vector<2x64xf32> -> vector<2x64xf32>
    %14 = arith.addf %12, %13 : vector<2x64xf32>
    %15 = vector.extract_strided_slice %14 {offsets = [0, 0], sizes = [2, 16], strides = [1, 1]} : vector<2x64xf32> to vector<2x16xf32>
    %16 = arith.negf %15 : vector<2x16xf32>
    %17 = math.exp %16 : vector<2x16xf32>
    %cst_11 = arith.constant 1.000000e+00 : f32
    %18 = vector.broadcast %cst_11 : f32 to vector<2x16xf32>
    %19 = arith.addf %18, %17 : vector<2x16xf32>
    %20 = arith.divf %18, %19 : vector<2x16xf32>
    %21 = vector.extract_strided_slice %14 {offsets = [0, 16], sizes = [2, 16], strides = [1, 1]} : vector<2x64xf32> to vector<2x16xf32>
    %22 = arith.negf %21 : vector<2x16xf32>
    %23 = math.exp %22 : vector<2x16xf32>
    %cst_12 = arith.constant 1.000000e+00 : f32
    %24 = vector.broadcast %cst_12 : f32 to vector<2x16xf32>
    %25 = arith.addf %24, %23 : vector<2x16xf32>
    %26 = arith.divf %24, %25 : vector<2x16xf32>
    %27 = vector.extract_strided_slice %14 {offsets = [0, 32], sizes = [2, 16], strides = [1, 1]} : vector<2x64xf32> to vector<2x16xf32>
    %28 = math.tanh %27 : vector<2x16xf32>
    %29 = vector.extract_strided_slice %14 {offsets = [0, 48], sizes = [2, 16], strides = [1, 1]} : vector<2x64xf32> to vector<2x16xf32>
    %30 = arith.negf %29 : vector<2x16xf32>
    %31 = math.exp %30 : vector<2x16xf32>
    %cst_13 = arith.constant 1.000000e+00 : f32
    %32 = vector.broadcast %cst_13 : f32 to vector<2x16xf32>
    %33 = arith.addf %32, %31 : vector<2x16xf32>
    %34 = arith.divf %32, %33 : vector<2x16xf32>
    %35 = arith.mulf %26, %6 : vector<2x16xf32>
    %36 = arith.mulf %20, %28 : vector<2x16xf32>
    %37 = arith.addf %35, %36 : vector<2x16xf32>
    %38 = math.tanh %37 : vector<2x16xf32>
    %39 = arith.mulf %34, %38 : vector<2x16xf32>
    %c0_14 = arith.constant 0 : index
    %40 = arith.index_cast %9 : i32 to index
    %c0_15 = arith.constant 0 : index
    %c0_16 = arith.constant 0 : index
    %41 = vector.load %arg4[%c0_14, %40, %c0_15, %c0_16] : memref<1x8x2x16xf32, #tpu.memory_space<vmem>>, vector<1x1x2x16xf32>
    %42 = vector.shape_cast %41 : vector<1x1x2x16xf32> to vector<2x16xf32>
    %43 = vector.shape_cast %39 : vector<2x16xf32> to vector<1x1x2x16xf32>
    tpu.vector_store %arg4[%c0_14, %40, %c0_15, %c0_16], %43 {strides = array<i32>} : memref<1x8x2x16xf32, #tpu.memory_space<vmem>>, vector<1x1x2x16xf32>,
    %c1_i32_17 = arith.constant 1 : i32
    %c1_i32_18 = arith.constant 1 : i32
    %44 = arith.cmpi eq, %arg0, %c1_i32_18 : i32
    %c7_i32_19 = arith.constant 7 : i32
    %45 = arith.subi %c7_i32_19, %c1_i32_17 : i32
    %46 = arith.select %44, %45, %c1_i32_17 : i32
    %c0_20 = arith.constant 0 : index
    %47 = arith.index_cast %46 : i32 to index
    %c0_21 = arith.constant 0 : index
    %c0_22 = arith.constant 0 : index
    %48 = vector.load %arg2[%c0_20, %47, %c0_21, %c0_22] : memref<1x8x2x64xf32, #tpu.memory_space<vmem>>, vector<1x1x2x64xf32>
    %49 = vector.shape_cast %48 : vector<1x1x2x64xf32> to vector<2x64xf32>
    %cst_23 = arith.constant dense<0.000000e+00> : vector<2x64xf32>
    %50 = tpu.matmul %39, %4, %cst_23 {dimension_numbers = #tpu.dot_dimension_numbers<[1], [0], [0], [1], [0, 0, 1, 1], [], []>} : vector<2x16xf32>, vector<16x64xf32>, vector<2x64xf32> -> vector<2x64xf32>
    %51 = arith.addf %49, %50 : vector<2x64xf32>
    %52 = vector.extract_strided_slice %51 {offsets = [0, 0], sizes = [2, 16], strides = [1, 1]} : vector<2x64xf32> to vector<2x16xf32>
    %53 = arith.negf %52 : vector<2x16xf32>
    %54 = math.exp %53 : vector<2x16xf32>
    %cst_24 = arith.constant 1.000000e+00 : f32
    %55 = vector.broadcast %cst_24 : f32 to vector<2x16xf32>
    %56 = arith.addf %55, %54 : vector<2x16xf32>
    %57 = arith.divf %55, %56 : vector<2x16xf32>
    %58 = vector.extract_strided_slice %51 {offsets = [0, 16], sizes = [2, 16], strides = [1, 1]} : vector<2x64xf32> to vector<2x16xf32>
    %59 = arith.negf %58 : vector<2x16xf32>
    %60 = math.exp %59 : vector<2x16xf32>
    %cst_25 = arith.constant 1.000000e+00 : f32
    %61 = vector.broadcast %cst_25 : f32 to vector<2x16xf32>
    %62 = arith.addf %61, %60 : vector<2x16xf32>
    %63 = arith.divf %61, %62 : vector<2x16xf32>
    %64 = vector.extract_strided_slice %51 {offsets = [0, 32], sizes = [2, 16], strides = [1, 1]} : vector<2x64xf32> to vector<2x16xf32>
    %65 = math.tanh %64 : vector<2x16xf32>
    %66 = vector.extract_strided_slice %51 {offsets = [0, 48], sizes = [2, 16], strides = [1, 1]} : vector<2x64xf32> to vector<2x16xf32>
    %67 = arith.negf %66 : vector<2x16xf32>
    %68 = math.exp %67 : vector<2x16xf32>
    %cst_26 = arith.constant 1.000000e+00 : f32
    %69 = vector.broadcast %cst_26 : f32 to vector<2x16xf32>
    %70 = arith.addf %69, %68 : vector<2x16xf32>
    %71 = arith.divf %69, %70 : vector<2x16xf32>
    %72 = arith.mulf %63, %37 : vector<2x16xf32>
    %73 = arith.mulf %57, %65 : vector<2x16xf32>
    %74 = arith.addf %72, %73 : vector<2x16xf32>
    %75 = math.tanh %74 : vector<2x16xf32>
    %76 = arith.mulf %71, %75 : vector<2x16xf32>
    %c0_27 = arith.constant 0 : index
    %77 = arith.index_cast %46 : i32 to index
    %c0_28 = arith.constant 0 : index
    %c0_29 = arith.constant 0 : index
    %78 = vector.load %arg4[%c0_27, %77, %c0_28, %c0_29] : memref<1x8x2x16xf32, #tpu.memory_space<vmem>>, vector<1x1x2x16xf32>
    %79 = vector.shape_cast %78 : vector<1x1x2x16xf32> to vector<2x16xf32>
    %80 = vector.shape_cast %76 : vector<2x16xf32> to vector<1x1x2x16xf32>
    tpu.vector_store %arg4[%c0_27, %77, %c0_28, %c0_29], %80 {strides = array<i32>} : memref<1x8x2x16xf32, #tpu.memory_space<vmem>>, vector<1x1x2x16xf32>,
    %c2_i32 = arith.constant 2 : i32
    %c1_i32_30 = arith.constant 1 : i32
    %81 = arith.cmpi eq, %arg0, %c1_i32_30 : i32
    %c7_i32_31 = arith.constant 7 : i32
    %82 = arith.subi %c7_i32_31, %c2_i32 : i32
    %83 = arith.select %81, %82, %c2_i32 : i32
    %c0_32 = arith.constant 0 : index
    %84 = arith.index_cast %83 : i32 to index
    %c0_33 = arith.constant 0 : index
    %c0_34 = arith.constant 0 : index
    %85 = vector.load %arg2[%c0_32, %84, %c0_33, %c0_34] : memref<1x8x2x64xf32, #tpu.memory_space<vmem>>, vector<1x1x2x64xf32>
    %86 = vector.shape_cast %85 : vector<1x1x2x64xf32> to vector<2x64xf32>
    %cst_35 = arith.constant dense<0.000000e+00> : vector<2x64xf32>
    %87 = tpu.matmul %76, %4, %cst_35 {dimension_numbers = #tpu.dot_dimension_numbers<[1], [0], [0], [1], [0, 0, 1, 1], [], []>} : vector<2x16xf32>, vector<16x64xf32>, vector<2x64xf32> -> vector<2x64xf32>
    %88 = arith.addf %86, %87 : vector<2x64xf32>
    %89 = vector.extract_strided_slice %88 {offsets = [0, 0], sizes = [2, 16], strides = [1, 1]} : vector<2x64xf32> to vector<2x16xf32>
    %90 = arith.negf %89 : vector<2x16xf32>
    %91 = math.exp %90 : vector<2x16xf32>
    %cst_36 = arith.constant 1.000000e+00 : f32
    %92 = vector.broadcast %cst_36 : f32 to vector<2x16xf32>
    %93 = arith.addf %92, %91 : vector<2x16xf32>
    %94 = arith.divf %92, %93 : vector<2x16xf32>
    %95 = vector.extract_strided_slice %88 {offsets = [0, 16], sizes = [2, 16], strides = [1, 1]} : vector<2x64xf32> to vector<2x16xf32>
    %96 = arith.negf %95 : vector<2x16xf32>
    %97 = math.exp %96 : vector<2x16xf32>
    %cst_37 = arith.constant 1.000000e+00 : f32
    %98 = vector.broadcast %cst_37 : f32 to vector<2x16xf32>
    %99 = arith.addf %98, %97 : vector<2x16xf32>
    %100 = arith.divf %98, %99 : vector<2x16xf32>
    %101 = vector.extract_strided_slice %88 {offsets = [0, 32], sizes = [2, 16], strides = [1, 1]} : vector<2x64xf32> to vector<2x16xf32>
    %102 = math.tanh %101 : vector<2x16xf32>
    %103 = vector.extract_strided_slice %88 {offsets = [0, 48], sizes = [2, 16], strides = [1, 1]} : vector<2x64xf32> to vector<2x16xf32>
    %104 = arith.negf %103 : vector<2x16xf32>
    %105 = math.exp %104 : vector<2x16xf32>
    %cst_38 = arith.constant 1.000000e+00 : f32
    %106 = vector.broadcast %cst_38 : f32 to vector<2x16xf32>
    %107 = arith.addf %106, %105 : vector<2x16xf32>
    %108 = arith.divf %106, %107 : vector<2x16xf32>
    %109 = arith.mulf %100, %74 : vector<2x16xf32>
    %110 = arith.mulf %94, %102 : vector<2x16xf32>
    %111 = arith.addf %109, %110 : vector<2x16xf32>
    %112 = math.tanh %111 : vector<2x16xf32>
    %113 = arith.mulf %108, %112 : vector<2x16xf32>
    %c0_39 = arith.constant 0 : index
    %114 = arith.index_cast %83 : i32 to index
    %c0_40 = arith.constant 0 : index
    %c0_41 = arith.constant 0 : index
    %115 = vector.load %arg4[%c0_39, %114, %c0_40, %c0_41] : memref<1x8x2x16xf32, #tpu.memory_space<vmem>>, vector<1x1x2x16xf32>
    %116 = vector.shape_cast %115 : vector<1x1x2x16xf32> to vector<2x16xf32>
    %117 = vector.shape_cast %113 : vector<2x16xf32> to vector<1x1x2x16xf32>
    tpu.vector_store %arg4[%c0_39, %114, %c0_40, %c0_41], %117 {strides = array<i32>} : memref<1x8x2x16xf32, #tpu.memory_space<vmem>>, vector<1x1x2x16xf32>,
    %c3_i32 = arith.constant 3 : i32
    %c1_i32_42 = arith.constant 1 : i32
    %118 = arith.cmpi eq, %arg0, %c1_i32_42 : i32
    %c7_i32_43 = arith.constant 7 : i32
    %119 = arith.subi %c7_i32_43, %c3_i32 : i32
    %120 = arith.select %118, %119, %c3_i32 : i32
    %c0_44 = arith.constant 0 : index
    %121 = arith.index_cast %120 : i32 to index
    %c0_45 = arith.constant 0 : index
    %c0_46 = arith.constant 0 : index
    %122 = vector.load %arg2[%c0_44, %121, %c0_45, %c0_46] : memref<1x8x2x64xf32, #tpu.memory_space<vmem>>, vector<1x1x2x64xf32>
    %123 = vector.shape_cast %122 : vector<1x1x2x64xf32> to vector<2x64xf32>
    %cst_47 = arith.constant dense<0.000000e+00> : vector<2x64xf32>
    %124 = tpu.matmul %113, %4, %cst_47 {dimension_numbers = #tpu.dot_dimension_numbers<[1], [0], [0], [1], [0, 0, 1, 1], [], []>} : vector<2x16xf32>, vector<16x64xf32>, vector<2x64xf32> -> vector<2x64xf32>
    %125 = arith.addf %123, %124 : vector<2x64xf32>
    %126 = vector.extract_strided_slice %125 {offsets = [0, 0], sizes = [2, 16], strides = [1, 1]} : vector<2x64xf32> to vector<2x16xf32>
    %127 = arith.negf %126 : vector<2x16xf32>
    %128 = math.exp %127 : vector<2x16xf32>
    %cst_48 = arith.constant 1.000000e+00 : f32
    %129 = vector.broadcast %cst_48 : f32 to vector<2x16xf32>
    %130 = arith.addf %129, %128 : vector<2x16xf32>
    %131 = arith.divf %129, %130 : vector<2x16xf32>
    %132 = vector.extract_strided_slice %125 {offsets = [0, 16], sizes = [2, 16], strides = [1, 1]} : vector<2x64xf32> to vector<2x16xf32>
    %133 = arith.negf %132 : vector<2x16xf32>
    %134 = math.exp %133 : vector<2x16xf32>
    %cst_49 = arith.constant 1.000000e+00 : f32
    %135 = vector.broadcast %cst_49 : f32 to vector<2x16xf32>
    %136 = arith.addf %135, %134 : vector<2x16xf32>
    %137 = arith.divf %135, %136 : vector<2x16xf32>
    %138 = vector.extract_strided_slice %125 {offsets = [0, 32], sizes = [2, 16], strides = [1, 1]} : vector<2x64xf32> to vector<2x16xf32>
    %139 = math.tanh %138 : vector<2x16xf32>
    %140 = vector.extract_strided_slice %125 {offsets = [0, 48], sizes = [2, 16], strides = [1, 1]} : vector<2x64xf32> to vector<2x16xf32>
    %141 = arith.negf %140 : vector<2x16xf32>
    %142 = math.exp %141 : vector<2x16xf32>
    %cst_50 = arith.constant 1.000000e+00 : f32
    %143 = vector.broadcast %cst_50 : f32 to vector<2x16xf32>
    %144 = arith.addf %143, %142 : vector<2x16xf32>
    %145 = arith.divf %143, %144 : vector<2x16xf32>
    %146 = arith.mulf %137, %111 : vector<2x16xf32>
    %147 = arith.mulf %131, %139 : vector<2x16xf32>
    %148 = arith.addf %146, %147 : vector<2x16xf32>
    %149 = math.tanh %148 : vector<2x16xf32>
    %150 = arith.mulf %145, %149 : vector<2x16xf32>
    %c0_51 = arith.constant 0 : index
    %151 = arith.index_cast %120 : i32 to index
    %c0_52 = arith.constant 0 : index
    %c0_53 = arith.constant 0 : index
    %152 = vector.load %arg4[%c0_51, %151, %c0_52, %c0_53] : memref<1x8x2x16xf32, #tpu.memory_space<vmem>>, vector<1x1x2x16xf32>
    %153 = vector.shape_cast %152 : vector<1x1x2x16xf32> to vector<2x16xf32>
    %154 = vector.shape_cast %150 : vector<2x16xf32> to vector<1x1x2x16xf32>
    tpu.vector_store %arg4[%c0_51, %151, %c0_52, %c0_53], %154 {strides = array<i32>} : memref<1x8x2x16xf32, #tpu.memory_space<vmem>>, vector<1x1x2x16xf32>,
    %c4_i32 = arith.constant 4 : i32
    %c1_i32_54 = arith.constant 1 : i32
    %155 = arith.cmpi eq, %arg0, %c1_i32_54 : i32
    %c7_i32_55 = arith.constant 7 : i32
    %156 = arith.subi %c7_i32_55, %c4_i32 : i32
    %157 = arith.select %155, %156, %c4_i32 : i32
    %c0_56 = arith.constant 0 : index
    %158 = arith.index_cast %157 : i32 to index
    %c0_57 = arith.constant 0 : index
    %c0_58 = arith.constant 0 : index
    %159 = vector.load %arg2[%c0_56, %158, %c0_57, %c0_58] : memref<1x8x2x64xf32, #tpu.memory_space<vmem>>, vector<1x1x2x64xf32>
    %160 = vector.shape_cast %159 : vector<1x1x2x64xf32> to vector<2x64xf32>
    %cst_59 = arith.constant dense<0.000000e+00> : vector<2x64xf32>
    %161 = tpu.matmul %150, %4, %cst_59 {dimension_numbers = #tpu.dot_dimension_numbers<[1], [0], [0], [1], [0, 0, 1, 1], [], []>} : vector<2x16xf32>, vector<16x64xf32>, vector<2x64xf32> -> vector<2x64xf32>
    %162 = arith.addf %160, %161 : vector<2x64xf32>
    %163 = vector.extract_strided_slice %162 {offsets = [0, 0], sizes = [2, 16], strides = [1, 1]} : vector<2x64xf32> to vector<2x16xf32>
    %164 = arith.negf %163 : vector<2x16xf32>
    %165 = math.exp %164 : vector<2x16xf32>
    %cst_60 = arith.constant 1.000000e+00 : f32
    %166 = vector.broadcast %cst_60 : f32 to vector<2x16xf32>
    %167 = arith.addf %166, %165 : vector<2x16xf32>
    %168 = arith.divf %166, %167 : vector<2x16xf32>
    %169 = vector.extract_strided_slice %162 {offsets = [0, 16], sizes = [2, 16], strides = [1, 1]} : vector<2x64xf32> to vector<2x16xf32>
    %170 = arith.negf %169 : vector<2x16xf32>
    %171 = math.exp %170 : vector<2x16xf32>
    %cst_61 = arith.constant 1.000000e+00 : f32
    %172 = vector.broadcast %cst_61 : f32 to vector<2x16xf32>
    %173 = arith.addf %172, %171 : vector<2x16xf32>
    %174 = arith.divf %172, %173 : vector<2x16xf32>
    %175 = vector.extract_strided_slice %162 {offsets = [0, 32], sizes = [2, 16], strides = [1, 1]} : vector<2x64xf32> to vector<2x16xf32>
    %176 = math.tanh %175 : vector<2x16xf32>
    %177 = vector.extract_strided_slice %162 {offsets = [0, 48], sizes = [2, 16], strides = [1, 1]} : vector<2x64xf32> to vector<2x16xf32>
    %178 = arith.negf %177 : vector<2x16xf32>
    %179 = math.exp %178 : vector<2x16xf32>
    %cst_62 = arith.constant 1.000000e+00 : f32
    %180 = vector.broadcast %cst_62 : f32 to vector<2x16xf32>
    %181 = arith.addf %180, %179 : vector<2x16xf32>
    %182 = arith.divf %180, %181 : vector<2x16xf32>
    %183 = arith.mulf %174, %148 : vector<2x16xf32>
    %184 = arith.mulf %168, %176 : vector<2x16xf32>
    %185 = arith.addf %183, %184 : vector<2x16xf32>
    %186 = math.tanh %185 : vector<2x16xf32>
    %187 = arith.mulf %182, %186 : vector<2x16xf32>
    %c0_63 = arith.constant 0 : index
    %188 = arith.index_cast %157 : i32 to index
    %c0_64 = arith.constant 0 : index
    %c0_65 = arith.constant 0 : index
    %189 = vector.load %arg4[%c0_63, %188, %c0_64, %c0_65] : memref<1x8x2x16xf32, #tpu.memory_space<vmem>>, vector<1x1x2x16xf32>
    %190 = vector.shape_cast %189 : vector<1x1x2x16xf32> to vector<2x16xf32>
    %191 = vector.shape_cast %187 : vector<2x16xf32> to vector<1x1x2x16xf32>
    tpu.vector_store %arg4[%c0_63, %188, %c0_64, %c0_65], %191 {strides = array<i32>} : memref<1x8x2x16xf32, #tpu.memory_space<vmem>>, vector<1x1x2x16xf32>,
    %c5_i32 = arith.constant 5 : i32
    %c1_i32_66 = arith.constant 1 : i32
    %192 = arith.cmpi eq, %arg0, %c1_i32_66 : i32
    %c7_i32_67 = arith.constant 7 : i32
    %193 = arith.subi %c7_i32_67, %c5_i32 : i32
    %194 = arith.select %192, %193, %c5_i32 : i32
    %c0_68 = arith.constant 0 : index
    %195 = arith.index_cast %194 : i32 to index
    %c0_69 = arith.constant 0 : index
    %c0_70 = arith.constant 0 : index
    %196 = vector.load %arg2[%c0_68, %195, %c0_69, %c0_70] : memref<1x8x2x64xf32, #tpu.memory_space<vmem>>, vector<1x1x2x64xf32>
    %197 = vector.shape_cast %196 : vector<1x1x2x64xf32> to vector<2x64xf32>
    %cst_71 = arith.constant dense<0.000000e+00> : vector<2x64xf32>
    %198 = tpu.matmul %187, %4, %cst_71 {dimension_numbers = #tpu.dot_dimension_numbers<[1], [0], [0], [1], [0, 0, 1, 1], [], []>} : vector<2x16xf32>, vector<16x64xf32>, vector<2x64xf32> -> vector<2x64xf32>
    %199 = arith.addf %197, %198 : vector<2x64xf32>
    %200 = vector.extract_strided_slice %199 {offsets = [0, 0], sizes = [2, 16], strides = [1, 1]} : vector<2x64xf32> to vector<2x16xf32>
    %201 = arith.negf %200 : vector<2x16xf32>
    %202 = math.exp %201 : vector<2x16xf32>
    %cst_72 = arith.constant 1.000000e+00 : f32
    %203 = vector.broadcast %cst_72 : f32 to vector<2x16xf32>
    %204 = arith.addf %203, %202 : vector<2x16xf32>
    %205 = arith.divf %203, %204 : vector<2x16xf32>
    %206 = vector.extract_strided_slice %199 {offsets = [0, 16], sizes = [2, 16], strides = [1, 1]} : vector<2x64xf32> to vector<2x16xf32>
    %207 = arith.negf %206 : vector<2x16xf32>
    %208 = math.exp %207 : vector<2x16xf32>
    %cst_73 = arith.constant 1.000000e+00 : f32
    %209 = vector.broadcast %cst_73 : f32 to vector<2x16xf32>
    %210 = arith.addf %209, %208 : vector<2x16xf32>
    %211 = arith.divf %209, %210 : vector<2x16xf32>
    %212 = vector.extract_strided_slice %199 {offsets = [0, 32], sizes = [2, 16], strides = [1, 1]} : vector<2x64xf32> to vector<2x16xf32>
    %213 = math.tanh %212 : vector<2x16xf32>
    %214 = vector.extract_strided_slice %199 {offsets = [0, 48], sizes = [2, 16], strides = [1, 1]} : vector<2x64xf32> to vector<2x16xf32>
    %215 = arith.negf %214 : vector<2x16xf32>
    %216 = math.exp %215 : vector<2x16xf32>
    %cst_74 = arith.constant 1.000000e+00 : f32
    %217 = vector.broadcast %cst_74 : f32 to vector<2x16xf32>
    %218 = arith.addf %217, %216 : vector<2x16xf32>
    %219 = arith.divf %217, %218 : vector<2x16xf32>
    %220 = arith.mulf %211, %185 : vector<2x16xf32>
    %221 = arith.mulf %205, %213 : vector<2x16xf32>
    %222 = arith.addf %220, %221 : vector<2x16xf32>
    %223 = math.tanh %222 : vector<2x16xf32>
    %224 = arith.mulf %219, %223 : vector<2x16xf32>
    %c0_75 = arith.constant 0 : index
    %225 = arith.index_cast %194 : i32 to index
    %c0_76 = arith.constant 0 : index
    %c0_77 = arith.constant 0 : index
    %226 = vector.load %arg4[%c0_75, %225, %c0_76, %c0_77] : memref<1x8x2x16xf32, #tpu.memory_space<vmem>>, vector<1x1x2x16xf32>
    %227 = vector.shape_cast %226 : vector<1x1x2x16xf32> to vector<2x16xf32>
    %228 = vector.shape_cast %224 : vector<2x16xf32> to vector<1x1x2x16xf32>
    tpu.vector_store %arg4[%c0_75, %225, %c0_76, %c0_77], %228 {strides = array<i32>} : memref<1x8x2x16xf32, #tpu.memory_space<vmem>>, vector<1x1x2x16xf32>,
    %c6_i32 = arith.constant 6 : i32
    %c1_i32_78 = arith.constant 1 : i32
    %229 = arith.cmpi eq, %arg0, %c1_i32_78 : i32
    %c7_i32_79 = arith.constant 7 : i32
    %230 = arith.subi %c7_i32_79, %c6_i32 : i32
    %231 = arith.select %229, %230, %c6_i32 : i32
    %c0_80 = arith.constant 0 : index
    %232 = arith.index_cast %231 : i32 to index
    %c0_81 = arith.constant 0 : index
    %c0_82 = arith.constant 0 : index
    %233 = vector.load %arg2[%c0_80, %232, %c0_81, %c0_82] : memref<1x8x2x64xf32, #tpu.memory_space<vmem>>, vector<1x1x2x64xf32>
    %234 = vector.shape_cast %233 : vector<1x1x2x64xf32> to vector<2x64xf32>
    %cst_83 = arith.constant dense<0.000000e+00> : vector<2x64xf32>
    %235 = tpu.matmul %224, %4, %cst_83 {dimension_numbers = #tpu.dot_dimension_numbers<[1], [0], [0], [1], [0, 0, 1, 1], [], []>} : vector<2x16xf32>, vector<16x64xf32>, vector<2x64xf32> -> vector<2x64xf32>
    %236 = arith.addf %234, %235 : vector<2x64xf32>
    %237 = vector.extract_strided_slice %236 {offsets = [0, 0], sizes = [2, 16], strides = [1, 1]} : vector<2x64xf32> to vector<2x16xf32>
    %238 = arith.negf %237 : vector<2x16xf32>
    %239 = math.exp %238 : vector<2x16xf32>
    %cst_84 = arith.constant 1.000000e+00 : f32
    %240 = vector.broadcast %cst_84 : f32 to vector<2x16xf32>
    %241 = arith.addf %240, %239 : vector<2x16xf32>
    %242 = arith.divf %240, %241 : vector<2x16xf32>
    %243 = vector.extract_strided_slice %236 {offsets = [0, 16], sizes = [2, 16], strides = [1, 1]} : vector<2x64xf32> to vector<2x16xf32>
    %244 = arith.negf %243 : vector<2x16xf32>
    %245 = math.exp %244 : vector<2x16xf32>
    %cst_85 = arith.constant 1.000000e+00 : f32
    %246 = vector.broadcast %cst_85 : f32 to vector<2x16xf32>
    %247 = arith.addf %246, %245 : vector<2x16xf32>
    %248 = arith.divf %246, %247 : vector<2x16xf32>
    %249 = vector.extract_strided_slice %236 {offsets = [0, 32], sizes = [2, 16], strides = [1, 1]} : vector<2x64xf32> to vector<2x16xf32>
    %250 = math.tanh %249 : vector<2x16xf32>
    %251 = vector.extract_strided_slice %236 {offsets = [0, 48], sizes = [2, 16], strides = [1, 1]} : vector<2x64xf32> to vector<2x16xf32>
    %252 = arith.negf %251 : vector<2x16xf32>
    %253 = math.exp %252 : vector<2x16xf32>
    %cst_86 = arith.constant 1.000000e+00 : f32
    %254 = vector.broadcast %cst_86 : f32 to vector<2x16xf32>
    %255 = arith.addf %254, %253 : vector<2x16xf32>
    %256 = arith.divf %254, %255 : vector<2x16xf32>
    %257 = arith.mulf %248, %222 : vector<2x16xf32>
    %258 = arith.mulf %242, %250 : vector<2x16xf32>
    %259 = arith.addf %257, %258 : vector<2x16xf32>
    %260 = math.tanh %259 : vector<2x16xf32>
    %261 = arith.mulf %256, %260 : vector<2x16xf32>
    %c0_87 = arith.constant 0 : index
    %262 = arith.index_cast %231 : i32 to index
    %c0_88 = arith.constant 0 : index
    %c0_89 = arith.constant 0 : index
    %263 = vector.load %arg4[%c0_87, %262, %c0_88, %c0_89] : memref<1x8x2x16xf32, #tpu.memory_space<vmem>>, vector<1x1x2x16xf32>
    %264 = vector.shape_cast %263 : vector<1x1x2x16xf32> to vector<2x16xf32>
    %265 = vector.shape_cast %261 : vector<2x16xf32> to vector<1x1x2x16xf32>
    tpu.vector_store %arg4[%c0_87, %262, %c0_88, %c0_89], %265 {strides = array<i32>} : memref<1x8x2x16xf32, #tpu.memory_space<vmem>>, vector<1x1x2x16xf32>,
    %c7_i32_90 = arith.constant 7 : i32
    %c1_i32_91 = arith.constant 1 : i32
    %266 = arith.cmpi eq, %arg0, %c1_i32_91 : i32
    %c7_i32_92 = arith.constant 7 : i32
    %267 = arith.subi %c7_i32_92, %c7_i32_90 : i32
    %268 = arith.select %266, %267, %c7_i32_90 : i32
    %c0_93 = arith.constant 0 : index
    %269 = arith.index_cast %268 : i32 to index
    %c0_94 = arith.constant 0 : index
    %c0_95 = arith.constant 0 : index
    %270 = vector.load %arg2[%c0_93, %269, %c0_94, %c0_95] : memref<1x8x2x64xf32, #tpu.memory_space<vmem>>, vector<1x1x2x64xf32>
    %271 = vector.shape_cast %270 : vector<1x1x2x64xf32> to vector<2x64xf32>
    %cst_96 = arith.constant dense<0.000000e+00> : vector<2x64xf32>
    %272 = tpu.matmul %261, %4, %cst_96 {dimension_numbers = #tpu.dot_dimension_numbers<[1], [0], [0], [1], [0, 0, 1, 1], [], []>} : vector<2x16xf32>, vector<16x64xf32>, vector<2x64xf32> -> vector<2x64xf32>
    %273 = arith.addf %271, %272 : vector<2x64xf32>
    %274 = vector.extract_strided_slice %273 {offsets = [0, 0], sizes = [2, 16], strides = [1, 1]} : vector<2x64xf32> to vector<2x16xf32>
    %275 = arith.negf %274 : vector<2x16xf32>
    %276 = math.exp %275 : vector<2x16xf32>
    %cst_97 = arith.constant 1.000000e+00 : f32
    %277 = vector.broadcast %cst_97 : f32 to vector<2x16xf32>
    %278 = arith.addf %277, %276 : vector<2x16xf32>
    %279 = arith.divf %277, %278 : vector<2x16xf32>
    %280 = vector.extract_strided_slice %273 {offsets = [0, 16], sizes = [2, 16], strides = [1, 1]} : vector<2x64xf32> to vector<2x16xf32>
    %281 = arith.negf %280 : vector<2x16xf32>
    %282 = math.exp %281 : vector<2x16xf32>
    %cst_98 = arith.constant 1.000000e+00 : f32
    %283 = vector.broadcast %cst_98 : f32 to vector<2x16xf32>
    %284 = arith.addf %283, %282 : vector<2x16xf32>
    %285 = arith.divf %283, %284 : vector<2x16xf32>
    %286 = vector.extract_strided_slice %273 {offsets = [0, 32], sizes = [2, 16], strides = [1, 1]} : vector<2x64xf32> to vector<2x16xf32>
    %287 = math.tanh %286 : vector<2x16xf32>
    %288 = vector.extract_strided_slice %273 {offsets = [0, 48], sizes = [2, 16], strides = [1, 1]} : vector<2x64xf32> to vector<2x16xf32>
    %289 = arith.negf %288 : vector<2x16xf32>
    %290 = math.exp %289 : vector<2x16xf32>
    %cst_99 = arith.constant 1.000000e+00 : f32
    %291 = vector.broadcast %cst_99 : f32 to vector<2x16xf32>
    %292 = arith.addf %291, %290 : vector<2x16xf32>
    %293 = arith.divf %291, %292 : vector<2x16xf32>
    %294 = arith.mulf %285, %259 : vector<2x16xf32>
    %295 = arith.mulf %279, %287 : vector<2x16xf32>
    %296 = arith.addf %294, %295 : vector<2x16xf32>
    %297 = math.tanh %296 : vector<2x16xf32>
    %298 = arith.mulf %293, %297 : vector<2x16xf32>
    %c0_100 = arith.constant 0 : index
    %299 = arith.index_cast %268 : i32 to index
    %c0_101 = arith.constant 0 : index
    %c0_102 = arith.constant 0 : index
    %300 = vector.load %arg4[%c0_100, %299, %c0_101, %c0_102] : memref<1x8x2x16xf32, #tpu.memory_space<vmem>>, vector<1x1x2x16xf32>
    %301 = vector.shape_cast %300 : vector<1x1x2x16xf32> to vector<2x16xf32>
    %302 = vector.shape_cast %298 : vector<2x16xf32> to vector<1x1x2x16xf32>
    tpu.vector_store %arg4[%c0_100, %299, %c0_101, %c0_102], %302 {strides = array<i32>} : memref<1x8x2x16xf32, #tpu.memory_space<vmem>>, vector<1x1x2x16xf32>,
    %c8_i32 = arith.constant 8 : i32
    %c0_103 = arith.constant 0 : index
    %c0_104 = arith.constant 0 : index
    %303 = vector.load %arg5[%c0_103, %c0_104] : memref<2x16xf32, #tpu.memory_space<vmem>>, vector<2x16xf32>
    tpu.vector_store %arg5[%c0_103, %c0_104], %298 {strides = array<i32>} : memref<2x16xf32, #tpu.memory_space<vmem>>, vector<2x16xf32>,
    %c0_105 = arith.constant 0 : index
    %c0_106 = arith.constant 0 : index
    %304 = vector.load %arg6[%c0_105, %c0_106] : memref<2x16xf32, #tpu.memory_space<vmem>>, vector<2x16xf32>
    tpu.vector_store %arg6[%c0_105, %c0_106], %296 {strides = array<i32>} : memref<2x16xf32, #tpu.memory_space<vmem>>, vector<2x16xf32>,
    return
  }
  func.func @transform_0(%arg0: i32, %arg1: i32) -> (i32, i32, i32, i32) {
    %c2_i32 = arith.constant 2 : i32
    %0 = arith.muli %c2_i32, %arg1 : i32
    %c0_i32 = arith.constant 0 : i32
    %1 = arith.subi %c0_i32, %0 : i32
    %2 = arith.muli %arg0, %1 : i32
    %3 = arith.addi %arg1, %2 : i32
    %c0_i32_0 = arith.constant 0 : i32
    %c0_i32_1 = arith.constant 0 : i32
    %c0_i32_2 = arith.constant 0 : i32
    return %arg0, %3, %c0_i32_0, %c0_i32_1 : i32, i32, i32, i32
  }
  func.func @transform_1(%arg0: i32, %arg1: i32) -> (i32, i32, i32) {
    %c0_i32 = arith.constant 0 : i32
    %c0_i32_0 = arith.constant 0 : i32
    %c0_i32_1 = arith.constant 0 : i32
    return %arg0, %c0_i32, %c0_i32_0 : i32, i32, i32
  }
  func.func @transform_2(%arg0: i32, %arg1: i32) -> (i32, i32, i32, i32) {
    %c2_i32 = arith.constant 2 : i32
    %0 = arith.muli %c2_i32, %arg1 : i32
    %c0_i32 = arith.constant 0 : i32
    %1 = arith.subi %c0_i32, %0 : i32
    %2 = arith.muli %arg0, %1 : i32
    %3 = arith.addi %arg1, %2 : i32
    %c0_i32_0 = arith.constant 0 : i32
    %c0_i32_1 = arith.constant 0 : i32
    %c0_i32_2 = arith.constant 0 : i32
    return %arg0, %3, %c0_i32_0, %c0_i32_1 : i32, i32, i32, i32
  }
}

</mosaic_0001>

<bundles_post_ra>
// kernel: tpu_custom_call.1
= control target key start
LH: loop header
LB: loop body
LE: loop exit
PB: predicated region body
PF: predicated region fallthrough
CT: control target
= control target key end

     0   :  { %s1662_s0 = inlined_call_operand.hbm [shape: f32[2,8,2,64], index: 0, kind: input, shape index: {}]   ;;  %s1663_s1 = inlined_call_operand.hbm [shape: f32[2,16,64], index: 1, kind: input, shape index: {}]   ;;  %s1664_s2 = inlined_call_operand.hbm [shape: f32[2,8,2,16], index: 2, kind: output, shape index: {}]  }
   0x1   :  { %1665 = sst [smem:[#allocation13_spill]] %s1662_s0 }
   0x2   :  { %7 = vsyncpa [#allocation5], 0 }
   0x3   :  { %9 = vsyncpa [#allocation5 + $0x1], 0 }
   0x4   :  { %10 = vsyncpa [#allocation8], 0 }
   0x5   :  { %12 = vsyncpa [#allocation8 + $0x1], 0 }
   0x6   :  { %13 = vsyncpa [#allocation6], 0 }
   0x7   :  { %15 = vsyncpa [#allocation6 + $0x1], 0  ;;  %s1367_s9 = smov 0   ;;  %s1369_s10 = smov 0  }
   0x8   :  { %s1371_s11 = smov 0   ;;  %s1373_s12 = smov 0  }
   0x9   :  { %s1375_s13 = smov 0   ;;  %s1377_s14 = smov 0  }
   0xa LB: > { %s1005_s15 = sadd.s32 4294967295, %s1339_s14   ;;  %s1006_s16 = sadd.s32 4294967294, %s1339_s14   ;;  %s1339_s14 = sphi %s1377_s14, %s21_s14   ;;  %s1335_s13 = sphi %s1375_s13, %s1676_s13   ;;  %s1331_s12 = sphi %s1373_s12, %s1675_s12   ;;  %s1327_s11 = sphi %s1371_s11, %s1674_s11   ;;  %s1323_s10 = sphi %s1369_s10, %s1673_s10   ;;  %s1319_s9 = sphi %s1367_s9, %s1672_s9  }
   0xb   : > { %s33_s17 = sadd.s32 1, %s1335_s13  ;;  %s50_s18 = sadd.s32 1, %s1327_s11 }
   0xc   : > { %p35_p0 = scmp.ge.s32.totalorder %s33_s17, 2  ;;  %p57_p1 = scmp.ne.s32.totalorder %s1327_s11, %s1323_s10 }
   0xd   : > { %p58_p2 = scmp.eq.s32.totalorder %s1339_s14, 0  ;;  %p63_p3 = scmp.ne.s32.totalorder %s1323_s10, %s1319_s9 }
   0xe   : > { %s1678_s17 = smov (%p35_p0, %s33_s17), 0  ;;  %p64_p5 = scmp.eq.s32.totalorder %s1005_s15, 0 }
   0xf   : > { %p1408_p4 = por %p58_p2, %p57_p1  ;;  %s45_s20 = ssub.s32 %s1335_s13, %s1678_s17 }
  0x10   : > { %p123_p6 = scmp.eq.s32.totalorder %s1005_s15, 1  ;;  %p48_p7 = scmp.eq.s32.totalorder %s45_s20, 0 }
  0x11   : > { %p1414_p8 = por %p64_p5, %p63_p3  ;;  %p129_p10 = scmp.eq.s32.totalorder %s1006_s16, 1 }
  0x12   : > { %p1418_p9 = por %p123_p6, %p57_p1  ;;  %p1008_p12 = scmp.ge.s32.totalorder %s1339_s14, 2 }
  0x13   : > { %s1423_s23 = scalar_select %p48_p7, %s1327_s11, %s50_s18  }
  0x14   : > { %p1425_p11 = por %p129_p10, %p63_p3  ;;  %p1068_p13 = scmp.lt.s32.totalorder %s1339_s14, 2 }
  0x15   : > { %s1432_s25 = sand.u32 1, %s1327_s11   ;;  %s1048_s27 = sshll.u32 %s1335_s13, 4 }
  0x16   : > { %s1009_s26 = sshll.u32 %s1432_s25, 4  ;;  %s1670_s0 = sld [smem:[#allocation13_spill]] }
  0x17   : > { %s153_s3 = scalar_lea.vmem [#allocation4], %s1009_s26  ;;  %p1441_p0 = pnand %p1068_p13, %p1408_p4 }
  0x18   : > { %s167_s4 = sshll.u32 %s153_s3, 4  ;;  %p1015_p1 = scmp.ge.s32.totalorder %s1339_s14, 1  ;;  %s168_s4 = int_to_ptr.vmem [resolvable:$true] %s167_s4 }
  0x19   : > { %s150_s7 = scalar_lea.sflag [#allocation5], %s1432_s25  ;;  %s1341_s8 = smov 32  }
  0x1a   : > { %s1342_s15 = smov 2   ;;  %p197_p2 = scmp.lt.s32.totalorder %s1339_s14, 3 }
  0x1b   : > { %s186_s20 = scalar_lea.hbm %s1663_s1, %s1048_s27  ;;  %s181_s19 = scalar_lea.vmem [#allocation7], %s1009_s26 }
  0x1c   : > { %s164_s30 = scalar_lea.hbm %s1670_s0, %s1048_s27  ;;  %p198_p3 = pnand %p1015_p1, %p197_p2 }
  0x1d   : > { %s165_s5 = sshll.u32 %s164_s30, 4  ;;  %s187_s28 = sshll.u32 %s186_s20, 4  ;;  %s166_s5 = int_to_ptr.hbm [resolvable:$true] %s165_s5  ;;  %s188_s28 = int_to_ptr.hbm [resolvable:$true] %s187_s28 }
  0x1e   : > { %1060 = dma.hbm_to_vmem [thread:$0]  (!%p1441_p0), %s166_s5, 256, %s168_s4, %s150_s7, %s1341_s8, %s1341_s8, %s1342_s15  }
  0x1f   : > { %s189_s29 = sshll.u32 %s181_s19, 4  ;;  %s178_s30 = scalar_lea.sflag [#allocation8], %s1432_s25  ;;  %s190_s29 = int_to_ptr.vmem [resolvable:$true] %s189_s29 }
  0x20   : > { %s1343_s3 = smov 128   ;;  %s1344_s0 = smov 8  }
  0x21   : > { %1063 = dma.hbm_to_vmem [thread:$0]  (!%p1441_p0), %s188_s28, 256, %s190_s29, %s178_s30, %s1343_s3, %s1343_s3, %s1344_s0  }
  0x22   : > { %201 = sbr.rel (%p198_p3) target bundleno = 4680 (0x1248), region = 28  ;;  %s1457_s4 = sand.u32 (!%p198_p3), 1, %s1323_s10  }
  0x23   : > { %s1460_s5 = sshll.u32 (!%p198_p3), %s1457_s4, 4  ;;  %s204_s27 = scalar_lea.sflag (!%p198_p3), [#allocation5], %s1457_s4 }
  0x24   : > { %s1464_s7 = scalar_lea.vmem (!%p198_p3), [#allocation4], %s1460_s5 }
  0x27   : > { %1306 = dma.done.wait (%p1414_p8), %s204_s27, 256  }
  0x28   : > { %1308 = vsyncadd (%p1414_p8), %s204_s27, 4294967040  ;;  %s214_s0 = scalar_lea.sflag [#allocation8], %s1457_s4  ;;  %s217_s25 = scalar_lea.vmem [#allocation7], %s1460_s5 }
  0x29   : > { %1310 = dma.done.wait (%p1414_p8), %s214_s0, 256  }
  0x2a   : > { %1312 = vsyncadd (%p1414_p8), %s214_s0, 4294967040  ;;  %vm258_vm0 = vcmask 123904   ;;  %v1345_v0 = vmov 0.0   ;;  %v262_v1 = vld [vmem:[%s217_s25 + $0x8] sm:$0xff]  ;;  %v261_v2 = vld [vmem:[%s217_s25] sm:$0xff]  ;;  %vm270_vm1 = vcmask 130048  }
  0x2b   : > { %259 = vst.msk [vmem:[#allocation2] sm:$0x3] %vm258_vm0, %v1345_v0  ;;  %288 = vmatpush.msra.mxu0 %v262_v1  ;;  %363 = vmatpush.msra.mxu1 %v262_v1  ;;  %p265_p4 = scmp.eq.s32.totalorder %s1331_s12, 1  ;;  %s1346_s8 = smov 96  }
  0x2c   : > { %260 = vst.msk [vmem:[#allocation3] sm:$0x3] %vm258_vm0, %v1345_v0  ;;  %433 = vmatpush.msra.mxu2 %v262_v1  ;;  %503 = vmatpush.msra.mxu3 %v262_v1  ;;  %s1347_s15 = smov 16   ;;  %s1348_s16 = smov 32  }
  0x2d   : > { %289 = vmatpush.msra.mxu0 %v261_v2  ;;  %364 = vmatpush.msra.mxu1 %v261_v2  ;;  %s1482_s21 = scalar_select %p265_p4, 7, 0 }
  0x2e   : > { %434 = vmatpush.msra.mxu2 %v261_v2  ;;  %504 = vmatpush.msra.mxu3 %v261_v2  ;;  %s1349_s18 = smov 80   ;;  %s1494_s20 = scalar_lea.vmem [#allocation9], %s1460_s5 }
  0x2f   : > { %573 = vmatpush.msrb.mxu0 %v262_v1  ;;  %643 = vmatpush.msrb.mxu1 %v262_v1  ;;  %s1019_s26 = sshll.u32 %s1482_s21, 1 }
  0x30   : > { %713 = vmatpush.msrb.mxu2 %v262_v1  ;;  %783 = vmatpush.msrb.mxu3 %v262_v1  ;;  %s268_s6 = scalar_lea.vmem %s1464_s7, %s1019_s26 [#allocation4]  ;;  %s340_s28 = scalar_lea.vmem %s1494_s20, %s1019_s26 [#allocation9] }
  0x31   : > { %574 = vmatpush.msrb.mxu0 %v261_v2  ;;  %644 = vmatpush.msrb.mxu1 %v261_v2  ;;  %v269_v4 = vld [vmem:[%s268_s6] sm:$0x3]  ;;  %s1503_s19 = scalar_select %p265_p4, 6, 1 }
  0x32   : > { %v263_v3 = vld [vmem:[#allocation2] sm:$0x3]  ;;  %714 = vmatpush.msrb.mxu2 %v261_v2  ;;  %784 = vmatpush.msrb.mxu3 %v261_v2  ;;  %s1520_s5 = scalar_select %p265_p4, 5, 2 }
  0x33   : > { %1020 = vmatmul.msk.f32.vlgmr.msra.gmra.mxu0 %vm270_vm1, %v263_v3  ;;  %v264_v8 = vld [vmem:[#allocation3] sm:$0x3]  ;;  %s1022_s29 = sshll.u32 %s1503_s19, 1 }
  0x34   : > { %s345_s30 = scalar_lea.vmem %s1464_s7, %s1022_s29 [#allocation4]  ;;  %s411_s3 = scalar_lea.vmem %s1494_s20, %s1022_s29 [#allocation9] }
  0x35   : > { %v346_v32 = vld [vmem:[%s345_s30] sm:$0x3]  ;;  %s1025_s27 = sshll.u32 %s1520_s5, 1 }
  0x36   : > { %s415_s0 = scalar_lea.vmem %s1464_s7, %s1025_s27 [#allocation4]  ;;  %s481_s25 = scalar_lea.vmem %s1494_s20, %s1025_s27 [#allocation9] }
  0x37   : > { %v416_v58 = vld [vmem:[%s415_s0] sm:$0x3]  ;;  %s1537_s21 = scalar_select %p265_p4, 4, 3 }
  0x38   : > { %s1554_s19 = scalar_select %p265_p4, 3, 4 }
  0x39   : > { %s1028_s26 = sshll.u32 %s1537_s21, 1 }
  0x3a   : > { %s485_s6 = scalar_lea.vmem %s1464_s7, %s1028_s26 [#allocation4]  ;;  %s1031_s29 = sshll.u32 %s1554_s19, 1 }
  0x3b   : > { %s555_s30 = scalar_lea.vmem %s1464_s7, %s1031_s29 [#allocation4] }
  0x3c   : > { %s1571_s5 = scalar_select %p265_p4, 2, 5 }
  0x3d   : > { %s1588_s21 = scalar_select %p265_p4, 1, 6 }
  0x3e   : > { %s1034_s27 = sshll.u32 %s1571_s5, 1 }
  0x3f   : > { %s625_s0 = scalar_lea.vmem %s1464_s7, %s1034_s27 [#allocation4] }
  0x40   : > { %s1605_s19 = scalar_select %p265_p4, 0, 7 }
  0xb0   : > { %v291_v5 = vpop.f32.mrf.mxu0 }
  0xb1   : > { %v294_v6 = vadd.f32 %v291_v5, %v269_v4 }
  0xb3   : > { %1129 = vtanh.f32 %v294_v6  ;;  %v1021_v9 = vmul.f32 -1.442695, %v294_v6 }
  0xb5   : > { %1131 = vpow2.f32 %v1021_v9 }
  0xb9   : > { %v1130_v7 = vpop.eup %1129 }
  0xba   : > { %321 = vrot.lane.b32.xlu0 %v1130_v7, %s1346_s8 }
  0xbb   : > { %v1132_v10 = vpop.eup %1131 }
  0xbc   : > { %v298_v11 = vadd.f32 1.0, %v1132_v10 }
  0xbe   : > { %1133 = vrcp.f32 %v298_v11  ;;  %v310_v17 = vand.u32 2147483648, %v298_v11  ;;  %vm304_vm3 = vweird.f32 %v298_v11  ;;  %v308_v18 = vand.u32 2147483647, %v298_v11 }
  0xc0   : > { %v311_v20 = vor.u32 1.1754944e-38, %v310_v17  ;;  %vm309_vm5 = vcmp.eq.f32.partialorder %v308_v18, 8.507059e+37 }
  0xc2   : > { %316 = vrot.lane.b32.xlu0 %v264_v8, %s1347_s15 }
  0xc4   : > { %v1134_v12 = vpop.eup %1133 }
  0xc5   : > { %v300_v13 = vmul.f32 %v1134_v12, %v298_v11  ;;  %vm305_vm2 = vweird.f32 %v1134_v12 }
  0xc6   : > { %vm306_vm4 = vmor %vm304_vm3, %vm305_vm2 }
  0xc7   : > { %v301_v14 = vsub.f32 1.0, %v300_v13 }
  0xc9   : > { %v302_v15 = vmul.f32 %v1134_v12, %v301_v14 }
  0xcb   : > { %v303_v16 = vadd.f32 %v1134_v12, %v302_v15 }
  0xcd   : > { %v307_v19 = vsel %vm306_vm4, %v1134_v12, %v303_v16 }
  0xce   : > { %v312_v22 = vsel %vm309_vm5, %v311_v20, %v307_v19  ;;  %v486_v20 = vld [vmem:[%s485_s6] sm:$0x3] }
 0x12c   : > { %v322_v21 = vpop.permute.xlu0 %321 }
 0x12d   : > { %v324_v23 = vmul.f32 %v322_v21, %v312_v22 }
 0x12f   : > { %326 = vrot.lane.b32.xlu1 %v324_v23, %s1347_s15 }
 0x134   : > { %v317_v24 = vpop.permute.xlu0 %316 }
 0x135   : > { %v319_v25 = vmul.f32 %v317_v24, %v312_v22 }
 0x1a1   : > { %v327_v26 = vpop.permute.xlu1 %326 }
 0x1a2   : > { %v329_v27 = vadd.f32 %v327_v26, %v319_v25 }
 0x1a4   : > { %1135 = vtanh.f32 %v329_v27 }
 0x1aa   : > { %v1136_v28 = vpop.eup %1135 }
 0x1ab   : > { %332 = vrot.lane.b32.xlu1 %v1136_v28, %s1348_s16 }
 0x21d   : > { %v333_v29 = vpop.permute.xlu1 %332 }
 0x21e   : > { %v335_v30 = vmul.f32 %v333_v29, %v312_v22 }
 0x220   : > { %337 = vrot.lane.b32.xlu2 %v335_v30, %s1349_s18 }
 0x27a   : > { %v338_v31 = vpop.permute.xlu2 %337 }
 0x27b   : > { %342 = vst.msk [vmem:[%s340_s28] sm:$0x3] %vm258_vm0, %v338_v31  ;;  %1023 = vmatmul.msk.f32.vlgmr.msra.gmra.mxu1 %vm270_vm1, %v338_v31  ;;  %s551_s28 = scalar_lea.vmem %s1494_s20, %s1028_s26 [#allocation9]  ;;  %s1037_s26 = sshll.u32 %s1588_s21, 1 }
 0x27c   : > { %s695_s6 = scalar_lea.vmem %s1464_s7, %s1037_s26 [#allocation4]  ;;  %s840_s21 = scalar_lea.sflag [#allocation6], %s1457_s4 }
 0x2f8   : > { %v366_v33 = vpop.f32.mrf.mxu1 }
 0x2f9   : > { %v369_v34 = vadd.f32 %v366_v33, %v346_v32 }
 0x2fb   : > { %1137 = vtanh.f32 %v369_v34  ;;  %v1024_v36 = vmul.f32 -1.442695, %v369_v34 }
 0x2fd   : > { %1139 = vpow2.f32 %v1024_v36 }
 0x301   : > { %v1138_v35 = vpop.eup %1137 }
 0x302   : > { %392 = vrot.lane.b32.xlu2 %v1138_v35, %s1346_s8 }
 0x303   : > { %v1140_v37 = vpop.eup %1139 }
 0x304   : > { %v373_v38 = vadd.f32 1.0, %v1140_v37 }
 0x306   : > { %1141 = vrcp.f32 %v373_v38  ;;  %v385_v44 = vand.u32 2147483648, %v373_v38  ;;  %vm379_vm7 = vweird.f32 %v373_v38  ;;  %v383_v45 = vand.u32 2147483647, %v373_v38 }
 0x308   : > { %v386_v47 = vor.u32 1.1754944e-38, %v385_v44  ;;  %vm384_vm9 = vcmp.eq.f32.partialorder %v383_v45, 8.507059e+37 }
 0x30c   : > { %v1142_v39 = vpop.eup %1141 }
 0x30d   : > { %v375_v40 = vmul.f32 %v1142_v39, %v373_v38  ;;  %vm380_vm6 = vweird.f32 %v1142_v39 }
 0x30e   : > { %vm381_vm8 = vmor %vm379_vm7, %vm380_vm6 }
 0x30f   : > { %v376_v41 = vsub.f32 1.0, %v375_v40 }
 0x311   : > { %v377_v42 = vmul.f32 %v1142_v39, %v376_v41 }
 0x313   : > { %v378_v43 = vadd.f32 %v1142_v39, %v377_v42 }
 0x315   : > { %v382_v46 = vsel %vm381_vm8, %v1142_v39, %v378_v43 }
 0x316   : > { %v387_v49 = vsel %vm384_vm9, %v386_v47, %v382_v46  ;;  %v556_v46 = vld [vmem:[%s555_s30] sm:$0x3] }
 0x317   : > { %v390_v51 = vmul.f32 %v387_v49, %v329_v27 }
 0x35c   : > { %v393_v48 = vpop.permute.xlu2 %392 }
 0x35d   : > { %v395_v50 = vmul.f32 %v393_v48, %v387_v49 }
 0x35f   : > { %397 = vrot.lane.b32.xlu0 %v395_v50, %s1347_s15 }
 0x3d1   : > { %v398_v52 = vpop.permute.xlu0 %397 }
 0x3d2   : > { %v400_v53 = vadd.f32 %v398_v52, %v390_v51 }
 0x3d4   : > { %1143 = vtanh.f32 %v400_v53 }
 0x3da   : > { %v1144_v54 = vpop.eup %1143 }
 0x3db   : > { %403 = vrot.lane.b32.xlu1 %v1144_v54, %s1348_s16 }
 0x44d   : > { %v404_v55 = vpop.permute.xlu1 %403 }
 0x44e   : > { %v406_v56 = vmul.f32 %v404_v55, %v387_v49 }
 0x450   : > { %408 = vrot.lane.b32.xlu2 %v406_v56, %s1349_s18 }
 0x4aa   : > { %v409_v57 = vpop.permute.xlu2 %408 }
 0x4ab   : > { %412 = vst.msk [vmem:[%s411_s3] sm:$0x3] %vm258_vm0, %v409_v57  ;;  %1026 = vmatmul.msk.f32.vlgmr.msra.gmra.mxu2 %vm270_vm1, %v409_v57  ;;  %s621_s3 = scalar_lea.vmem %s1494_s20, %s1031_s29 [#allocation9]  ;;  %s1040_s29 = sshll.u32 %s1605_s19, 1 }
 0x4ac   : > { %s765_s30 = scalar_lea.vmem %s1464_s7, %s1040_s29 [#allocation4]  ;;  %s1350_s7 = smov 112  }
 0x52e   : > { %v436_v59 = vpop.f32.mrf.mxu2 }
 0x52f   : > { %v439_v60 = vadd.f32 %v436_v59, %v416_v58 }
 0x531   : > { %1145 = vtanh.f32 %v439_v60  ;;  %v1027_v62 = vmul.f32 -1.442695, %v439_v60 }
 0x533   : > { %1147 = vpow2.f32 %v1027_v62 }
 0x537   : > { %v1146_v61 = vpop.eup %1145 }
 0x538   : > { %462 = vrot.lane.b32.xlu0 %v1146_v61, %s1346_s8 }
 0x539   : > { %v1148_v63 = vpop.eup %1147 }
 0x53a   : > { %v443_v0 = vadd.f32 1.0, %v1148_v63 }
 0x53c   : > { %1149 = vrcp.f32 %v443_v0  ;;  %v455_v6 = vand.u32 2147483648, %v443_v0  ;;  %vm449_vm11 = vweird.f32 %v443_v0  ;;  %v453_v7 = vand.u32 2147483647, %v443_v0 }
 0x53e   : > { %v456_v9 = vor.u32 1.1754944e-38, %v455_v6  ;;  %vm454_vm13 = vcmp.eq.f32.partialorder %v453_v7, 8.507059e+37 }
 0x542   : > { %v1150_v1 = vpop.eup %1149 }
 0x543   : > { %v445_v2 = vmul.f32 %v1150_v1, %v443_v0  ;;  %vm450_vm10 = vweird.f32 %v1150_v1 }
 0x544   : > { %vm451_vm12 = vmor %vm449_vm11, %vm450_vm10 }
 0x545   : > { %v446_v3 = vsub.f32 1.0, %v445_v2 }
 0x547   : > { %v447_v4 = vmul.f32 %v1150_v1, %v446_v3 }
 0x549   : > { %v448_v5 = vadd.f32 %v1150_v1, %v447_v4 }
 0x54b   : > { %v452_v8 = vsel %vm451_vm12, %v1150_v1, %v448_v5 }
 0x54c   : > { %v457_v11 = vsel %vm454_vm13, %v456_v9, %v452_v8  ;;  %v626_v8 = vld [vmem:[%s625_s0] sm:$0x3] }
 0x54d   : > { %v460_v13 = vmul.f32 %v457_v11, %v400_v53 }
 0x5aa   : > { %v463_v10 = vpop.permute.xlu0 %462 }
 0x5ab   : > { %v465_v12 = vmul.f32 %v463_v10, %v457_v11 }
 0x5ad   : > { %467 = vrot.lane.b32.xlu1 %v465_v12, %s1347_s15 }
 0x61f   : > { %v468_v14 = vpop.permute.xlu1 %467 }
 0x620   : > { %v470_v15 = vadd.f32 %v468_v14, %v460_v13 }
 0x622   : > { %1151 = vtanh.f32 %v470_v15 }
 0x628   : > { %v1152_v16 = vpop.eup %1151 }
 0x629   : > { %473 = vrot.lane.b32.xlu2 %v1152_v16, %s1348_s16 }
 0x683   : > { %v474_v17 = vpop.permute.xlu2 %473 }
 0x684   : > { %v476_v18 = vmul.f32 %v474_v17, %v457_v11 }
 0x686   : > { %478 = vrot.lane.b32.xlu0 %v476_v18, %s1349_s18 }
 0x6f8   : > { %v479_v19 = vpop.permute.xlu0 %478 }
 0x6f9   : > { %482 = vst.msk [vmem:[%s481_s25] sm:$0x3] %vm258_vm0, %v479_v19  ;;  %1029 = vmatmul.msk.f32.vlgmr.msra.gmra.mxu3 %vm270_vm1, %v479_v19  ;;  %s691_s25 = scalar_lea.vmem %s1494_s20, %s1034_s27 [#allocation9]  ;;  %s858_s27 = sshll.u32 %s1494_s20, 4  ;;  %s859_s27 = int_to_ptr.vmem [resolvable:$true] %s858_s27 }
 0x77c   : > { %v506_v21 = vpop.f32.mrf.mxu3 }
 0x77d   : > { %v509_v22 = vadd.f32 %v506_v21, %v486_v20 }
 0x77f   : > { %1153 = vtanh.f32 %v509_v22  ;;  %v1030_v24 = vmul.f32 -1.442695, %v509_v22 }
 0x781   : > { %1155 = vpow2.f32 %v1030_v24 }
 0x785   : > { %v1154_v23 = vpop.eup %1153 }
 0x786   : > { %532 = vrot.lane.b32.xlu1 %v1154_v23, %s1346_s8 }
 0x787   : > { %v1156_v25 = vpop.eup %1155 }
 0x788   : > { %v513_v26 = vadd.f32 1.0, %v1156_v25 }
 0x78a   : > { %1157 = vrcp.f32 %v513_v26  ;;  %v525_v32 = vand.u32 2147483648, %v513_v26  ;;  %vm519_vm15 = vweird.f32 %v513_v26  ;;  %v523_v33 = vand.u32 2147483647, %v513_v26 }
 0x78c   : > { %v526_v35 = vor.u32 1.1754944e-38, %v525_v32  ;;  %vm524_vm3 = vcmp.eq.f32.partialorder %v523_v33, 8.507059e+37 }
 0x790   : > { %v1158_v27 = vpop.eup %1157 }
 0x791   : > { %v515_v28 = vmul.f32 %v1158_v27, %v513_v26  ;;  %vm520_vm14 = vweird.f32 %v1158_v27 }
 0x792   : > { %vm521_vm2 = vmor %vm519_vm15, %vm520_vm14 }
 0x793   : > { %v516_v29 = vsub.f32 1.0, %v515_v28 }
 0x795   : > { %v517_v30 = vmul.f32 %v1158_v27, %v516_v29 }
 0x797   : > { %v518_v31 = vadd.f32 %v1158_v27, %v517_v30 }
 0x799   : > { %v522_v34 = vsel %vm521_vm2, %v1158_v27, %v518_v31 }
 0x79a   : > { %v527_v37 = vsel %vm524_vm3, %v526_v35, %v522_v34  ;;  %v696_v34 = vld [vmem:[%s695_s6] sm:$0x3] }
 0x79b   : > { %v530_v39 = vmul.f32 %v527_v37, %v470_v15 }
 0x7f8   : > { %v533_v36 = vpop.permute.xlu1 %532 }
 0x7f9   : > { %v535_v38 = vmul.f32 %v533_v36, %v527_v37 }
 0x7fb   : > { %537 = vrot.lane.b32.xlu2 %v535_v38, %s1347_s15 }
 0x855   : > { %v538_v40 = vpop.permute.xlu2 %537 }
 0x856   : > { %v540_v41 = vadd.f32 %v538_v40, %v530_v39 }
 0x858   : > { %1159 = vtanh.f32 %v540_v41 }
 0x85e   : > { %v1160_v42 = vpop.eup %1159 }
 0x85f   : > { %543 = vrot.lane.b32.xlu0 %v1160_v42, %s1348_s16 }
 0x8d1   : > { %v544_v43 = vpop.permute.xlu0 %543 }
 0x8d2   : > { %v546_v44 = vmul.f32 %v544_v43, %v527_v37 }
 0x8d4   : > { %548 = vrot.lane.b32.xlu1 %v546_v44, %s1349_s18 }
 0x946   : > { %v549_v45 = vpop.permute.xlu1 %548 }
 0x947   : > { %552 = vst.msk [vmem:[%s551_s28] sm:$0x3] %vm258_vm0, %v549_v45  ;;  %1032 = vmatmul.msk.f32.vlgmr.msrb.gmra.mxu0 %vm270_vm1, %v549_v45  ;;  %s761_s28 = scalar_lea.vmem %s1494_s20, %s1037_s26 [#allocation9] }
 0x9c4   : > { %v576_v47 = vpop.f32.mrf.mxu0 }
 0x9c5   : > { %v579_v48 = vadd.f32 %v576_v47, %v556_v46 }
 0x9c7   : > { %1161 = vtanh.f32 %v579_v48  ;;  %v1033_v50 = vmul.f32 -1.442695, %v579_v48 }
 0x9c9   : > { %1163 = vpow2.f32 %v1033_v50 }
 0x9cd   : > { %v1162_v49 = vpop.eup %1161 }
 0x9ce   : > { %602 = vrot.lane.b32.xlu2 %v1162_v49, %s1346_s8 }
 0x9cf   : > { %v1164_v51 = vpop.eup %1163 }
 0x9d0   : > { %v583_v52 = vadd.f32 1.0, %v1164_v51 }
 0x9d2   : > { %1165 = vrcp.f32 %v583_v52  ;;  %v595_v58 = vand.u32 2147483648, %v583_v52  ;;  %vm589_vm5 = vweird.f32 %v583_v52  ;;  %v593_v59 = vand.u32 2147483647, %v583_v52 }
 0x9d4   : > { %v596_v61 = vor.u32 1.1754944e-38, %v595_v58  ;;  %vm594_vm7 = vcmp.eq.f32.partialorder %v593_v59, 8.507059e+37 }
 0x9d8   : > { %v1166_v53 = vpop.eup %1165 }
 0x9d9   : > { %v585_v54 = vmul.f32 %v1166_v53, %v583_v52  ;;  %vm590_vm4 = vweird.f32 %v1166_v53 }
 0x9da   : > { %vm591_vm6 = vmor %vm589_vm5, %vm590_vm4 }
 0x9db   : > { %v586_v55 = vsub.f32 1.0, %v585_v54 }
 0x9dd   : > { %v587_v56 = vmul.f32 %v1166_v53, %v586_v55 }
 0x9df   : > { %v588_v57 = vadd.f32 %v1166_v53, %v587_v56 }
 0x9e1   : > { %v592_v60 = vsel %vm591_vm6, %v1166_v53, %v588_v57 }
 0x9e2   : > { %v597_v63 = vsel %vm594_vm7, %v596_v61, %v592_v60  ;;  %v766_v60 = vld [vmem:[%s765_s30] sm:$0x3] }
 0x9e3   : > { %v600_v1 = vmul.f32 %v597_v63, %v540_v41 }
 0xa28   : > { %v603_v62 = vpop.permute.xlu2 %602 }
 0xa29   : > { %v605_v0 = vmul.f32 %v603_v62, %v597_v63 }
 0xa2b   : > { %607 = vrot.lane.b32.xlu0 %v605_v0, %s1347_s15 }
 0xa9d   : > { %v608_v2 = vpop.permute.xlu0 %607 }
 0xa9e   : > { %v610_v3 = vadd.f32 %v608_v2, %v600_v1 }
 0xaa0   : > { %1167 = vtanh.f32 %v610_v3 }
 0xaa6   : > { %v1168_v4 = vpop.eup %1167 }
 0xaa7   : > { %613 = vrot.lane.b32.xlu1 %v1168_v4, %s1348_s16 }
 0xb19   : > { %v614_v5 = vpop.permute.xlu1 %613 }
 0xb1a   : > { %v616_v6 = vmul.f32 %v614_v5, %v597_v63 }
 0xb1c   : > { %618 = vrot.lane.b32.xlu2 %v616_v6, %s1349_s18 }
 0xb76   : > { %v619_v7 = vpop.permute.xlu2 %618 }
 0xb77   : > { %622 = vst.msk [vmem:[%s621_s3] sm:$0x3] %vm258_vm0, %v619_v7  ;;  %1035 = vmatmul.msk.f32.vlgmr.msrb.gmra.mxu1 %vm270_vm1, %v619_v7 }
 0xbf4   : > { %v646_v9 = vpop.f32.mrf.mxu1 }
 0xbf5   : > { %v649_v10 = vadd.f32 %v646_v9, %v626_v8 }
 0xbf7   : > { %1169 = vtanh.f32 %v649_v10  ;;  %v1036_v12 = vmul.f32 -1.442695, %v649_v10 }
 0xbf9   : > { %1171 = vpow2.f32 %v1036_v12 }
 0xbfd   : > { %v1170_v11 = vpop.eup %1169 }
 0xbfe   : > { %672 = vrot.lane.b32.xlu0 %v1170_v11, %s1346_s8 }
 0xbff   : > { %v1172_v13 = vpop.eup %1171 }
 0xc00   : > { %v653_v14 = vadd.f32 1.0, %v1172_v13 }
 0xc02   : > { %1173 = vrcp.f32 %v653_v14  ;;  %v665_v20 = vand.u32 2147483648, %v653_v14  ;;  %vm659_vm9 = vweird.f32 %v653_v14  ;;  %v663_v21 = vand.u32 2147483647, %v653_v14 }
 0xc04   : > { %v666_v23 = vor.u32 1.1754944e-38, %v665_v20  ;;  %vm664_vm11 = vcmp.eq.f32.partialorder %v663_v21, 8.507059e+37 }
 0xc08   : > { %v1174_v15 = vpop.eup %1173 }
 0xc09   : > { %v655_v16 = vmul.f32 %v1174_v15, %v653_v14  ;;  %vm660_vm8 = vweird.f32 %v1174_v15 }
 0xc0a   : > { %vm661_vm10 = vmor %vm659_vm9, %vm660_vm8 }
 0xc0b   : > { %v656_v17 = vsub.f32 1.0, %v655_v16 }
 0xc0d   : > { %v657_v18 = vmul.f32 %v1174_v15, %v656_v17 }
 0xc0f   : > { %v658_v19 = vadd.f32 %v1174_v15, %v657_v18 }
 0xc11   : > { %v662_v22 = vsel %vm661_vm10, %v1174_v15, %v658_v19 }
 0xc12   : > { %v667_v25 = vsel %vm664_vm11, %v666_v23, %v662_v22 }
 0xc13   : > { %v670_v27 = vmul.f32 %v667_v25, %v610_v3 }
 0xc70   : > { %v673_v24 = vpop.permute.xlu0 %672 }
 0xc71   : > { %v675_v26 = vmul.f32 %v673_v24, %v667_v25 }
 0xc73   : > { %677 = vrot.lane.b32.xlu1 %v675_v26, %s1347_s15 }
 0xce5   : > { %v678_v28 = vpop.permute.xlu1 %677 }
 0xce6   : > { %v680_v29 = vadd.f32 %v678_v28, %v670_v27 }
 0xce8   : > { %1175 = vtanh.f32 %v680_v29 }
 0xcee   : > { %v1176_v30 = vpop.eup %1175 }
 0xcef   : > { %683 = vrot.lane.b32.xlu2 %v1176_v30, %s1348_s16 }
 0xd49   : > { %v684_v31 = vpop.permute.xlu2 %683 }
 0xd4a   : > { %v686_v32 = vmul.f32 %v684_v31, %v667_v25 }
 0xd4c   : > { %688 = vrot.lane.b32.xlu0 %v686_v32, %s1349_s18 }
 0xdbe   : > { %v689_v33 = vpop.permute.xlu0 %688 }
 0xdbf   : > { %692 = vst.msk [vmem:[%s691_s25] sm:$0x3] %vm258_vm0, %v689_v33  ;;  %1038 = vmatmul.msk.f32.vlgmr.msrb.gmra.mxu2 %vm270_vm1, %v689_v33  ;;  %s831_s25 = scalar_lea.vmem %s1494_s20, %s1040_s29 [#allocation9] }
 0xe42   : > { %v716_v35 = vpop.f32.mrf.mxu2 }
 0xe43   : > { %v719_v36 = vadd.f32 %v716_v35, %v696_v34 }
 0xe45   : > { %1177 = vtanh.f32 %v719_v36  ;;  %v1039_v38 = vmul.f32 -1.442695, %v719_v36 }
 0xe47   : > { %1179 = vpow2.f32 %v1039_v38 }
 0xe4b   : > { %v1178_v37 = vpop.eup %1177 }
 0xe4c   : > { %742 = vrot.lane.b32.xlu1 %v1178_v37, %s1346_s8 }
 0xe4d   : > { %v1180_v39 = vpop.eup %1179 }
 0xe4e   : > { %v723_v40 = vadd.f32 1.0, %v1180_v39 }
 0xe50   : > { %1181 = vrcp.f32 %v723_v40  ;;  %v735_v46 = vand.u32 2147483648, %v723_v40  ;;  %vm729_vm13 = vweird.f32 %v723_v40  ;;  %v733_v47 = vand.u32 2147483647, %v723_v40 }
 0xe52   : > { %v736_v49 = vor.u32 1.1754944e-38, %v735_v46  ;;  %vm734_vm15 = vcmp.eq.f32.partialorder %v733_v47, 8.507059e+37 }
 0xe56   : > { %v1182_v41 = vpop.eup %1181 }
 0xe57   : > { %v725_v42 = vmul.f32 %v1182_v41, %v723_v40  ;;  %vm730_vm12 = vweird.f32 %v1182_v41 }
 0xe58   : > { %vm731_vm14 = vmor %vm729_vm13, %vm730_vm12 }
 0xe59   : > { %v726_v43 = vsub.f32 1.0, %v725_v42 }
 0xe5b   : > { %v727_v44 = vmul.f32 %v1182_v41, %v726_v43 }
 0xe5d   : > { %v728_v45 = vadd.f32 %v1182_v41, %v727_v44 }
 0xe5f   : > { %v732_v48 = vsel %vm731_vm14, %v1182_v41, %v728_v45 }
 0xe60   : > { %v737_v51 = vsel %vm734_vm15, %v736_v49, %v732_v48 }
 0xe61   : > { %v740_v53 = vmul.f32 %v737_v51, %v680_v29 }
 0xebe   : > { %v743_v50 = vpop.permute.xlu1 %742 }
 0xebf   : > { %v745_v52 = vmul.f32 %v743_v50, %v737_v51 }
 0xec1   : > { %747 = vrot.lane.b32.xlu2 %v745_v52, %s1347_s15 }
 0xf1b   : > { %v748_v54 = vpop.permute.xlu2 %747 }
 0xf1c   : > { %v750_v55 = vadd.f32 %v748_v54, %v740_v53 }
 0xf1e   : > { %1183 = vtanh.f32 %v750_v55 }
 0xf24   : > { %v1184_v56 = vpop.eup %1183 }
 0xf25   : > { %753 = vrot.lane.b32.xlu0 %v1184_v56, %s1348_s16 }
 0xf97   : > { %v754_v57 = vpop.permute.xlu0 %753 }
 0xf98   : > { %v756_v58 = vmul.f32 %v754_v57, %v737_v51 }
 0xf9a   : > { %758 = vrot.lane.b32.xlu1 %v756_v58, %s1349_s18 }
0x100c   : > { %v759_v59 = vpop.permute.xlu1 %758 }
0x100d   : > { %762 = vst.msk [vmem:[%s761_s28] sm:$0x3] %vm258_vm0, %v759_v59  ;;  %1041 = vmatmul.msk.f32.vlgmr.msrb.gmra.mxu3 %vm270_vm1, %v759_v59  ;;  %s1273_s28 = scalar_lea.hbm %s1664_s2, 32 }
0x1090   : > { %v786_v61 = vpop.f32.mrf.mxu3 }
0x1091   : > { %v789_v62 = vadd.f32 %v786_v61, %v766_v60 }
0x1093   : > { %1185 = vtanh.f32 %v789_v62  ;;  %v1042_v0 = vmul.f32 -1.442695, %v789_v62 }
0x1095   : > { %1187 = vpow2.f32 %v1042_v0 }
0x1099   : > { %v1186_v63 = vpop.eup %1185 }
0x109a   : > { %812 = vrot.lane.b32.xlu2 %v1186_v63, %s1346_s8  ;;  %s1050_s8 = sshll.u32 %s1331_s12, 4 }
0x109b   : > { %v1188_v1 = vpop.eup %1187  ;;  %s857_s5 = scalar_lea.hbm %s1664_s2, %s1050_s8 }
0x109c   : > { %v793_v2 = vadd.f32 1.0, %v1188_v1  ;;  %s860_s0 = sshll.u32 %s857_s5, 4  ;;  %s861_s0 = int_to_ptr.hbm [resolvable:$true] %s860_s0 }
0x109d   : > { %s1267_s26 = sshra.s32 %s861_s0, 4  ;;  %s1268_s26 = int_to_ptr.hbm [resolvable:$true] %s1267_s26 }
0x109e   : > { %1189 = vrcp.f32 %v793_v2  ;;  %v805_v8 = vand.u32 2147483648, %v793_v2  ;;  %vm799_vm2 = vweird.f32 %v793_v2  ;;  %v803_v9 = vand.u32 2147483647, %v793_v2  ;;  %p1274_p8 = scmp.lt.s32.totalorder %s1268_s26, %s1664_s2 }
0x10a0   : > { %v806_v11 = vor.u32 1.1754944e-38, %v805_v8  ;;  %vm804_vm4 = vcmp.eq.f32.partialorder %v803_v9, 8.507059e+37 }
0x10a4   : > { %v1190_v3 = vpop.eup %1189 }
0x10a5   : > { %v795_v4 = vmul.f32 %v1190_v3, %v793_v2  ;;  %vm800_vm1 = vweird.f32 %v1190_v3 }
0x10a6   : > { %vm801_vm3 = vmor %vm799_vm2, %vm800_vm1 }
0x10a7   : > { %v796_v5 = vsub.f32 1.0, %v795_v4 }
0x10a9   : > { %v797_v6 = vmul.f32 %v1190_v3, %v796_v5 }
0x10ab   : > { %v798_v7 = vadd.f32 %v1190_v3, %v797_v6 }
0x10ad   : > { %v802_v10 = vsel %vm801_vm3, %v1190_v3, %v798_v7 }
0x10ae   : > { %v807_v13 = vsel %vm804_vm4, %v806_v11, %v802_v10 }
0x10af   : > { %v810_v15 = vmul.f32 %v807_v13, %v750_v55 }
0x10f4   : > { %v813_v12 = vpop.permute.xlu2 %812 }
0x10f5   : > { %v815_v14 = vmul.f32 %v813_v12, %v807_v13 }
0x10f7   : > { %817 = vrot.lane.b32.xlu0 %v815_v14, %s1347_s15 }
0x1169   : > { %v818_v16 = vpop.permute.xlu0 %817 }
0x116a   : > { %v820_v17 = vadd.f32 %v818_v16, %v810_v15 }
0x116c   : > { %1191 = vtanh.f32 %v820_v17  ;;  %835 = vrot.lane.b32.xlu0 %v820_v17, %s1350_s7 }
0x1172   : > { %v1192_v18 = vpop.eup %1191 }
0x1173   : > { %823 = vrot.lane.b32.xlu1 %v1192_v18, %s1348_s16 }
0x11de   : > { %v836_v19 = vpop.permute.xlu0 %835 }
0x11df   : > { %838 = vst.msk [vmem:[#allocation3] sm:$0x3] %vm258_vm0, %v836_v19 }
0x11e5   : > { %v824_v20 = vpop.permute.xlu1 %823 }
0x11e6   : > { %v826_v21 = vmul.f32 %v824_v20, %v807_v13 }
0x11e8   : > { %828 = vrot.lane.b32.xlu2 %v826_v21, %s1349_s18  ;;  %s1269_s18 = scalar_lea.hbm %s1268_s26, 16 }
0x11e9   : > { %p1270_p5 = scmp.ne.s32.totalorder %s1268_s26, %s1269_s18  ;;  %p1275_p10 = scmp.lt.s32.totalorder %s1273_s28, %s1269_s18 }
0x11eb   : > { %p1271_p6 = pnand %p1270_p5, %p1418_p9  ;;  %p1276_p13 = por %p1275_p10, %p1274_p8 }
0x11ed   : > { %p1272_p7 = pneg %p1271_p6 }
0x11ef   : > { %p1277_p0 = pnand %p1276_p13, %p1272_p7 }
0x1242   : > { %v829_v22 = vpop.permute.xlu2 %828 }
0x1243   : > { %832 = vst.msk [vmem:[%s831_s25] sm:$0x3] %vm258_vm0, %v829_v22 }
0x1244   : > { %833 = vst.msk [vmem:[#allocation2] sm:$0x3] %vm258_vm0, %v829_v22 }
0x1245   : > { %1280 = shalt.err (!%p1277_p0)
}
0x1246   : > { %s1351_s4 = smov 2  }
0x1247   : > { %1055 = dma.vmem_to_hbm [thread:$0]  (%p1418_p9), %s859_s27, 256, %s861_s0, %s840_s21, %s1348_s16, %s1348_s16, %s1351_s4  }
0x1248 PF: > { %s875_s29 = sand.u32 1, %s1319_s9   ;;  %p1065_p1 = pnand %p1008_p12, %p1425_p11 }
0x1249   : > { %s876_s30 = scalar_lea.sflag [#allocation6], %s875_s29 }
0x124a   : > { %p1066_p2 = pneg %p1065_p1 }
0x124c   : > { %1314 = dma.done.wait (%p1066_p2), %s876_s30, 256  }
0x124d   : > { %1316 = vsyncadd (%p1066_p2), %s876_s30, 4294967040  ;;  %s21_s14 = sadd.s32 1, %s1339_s14   ;;  %s1672_s9 = smov %s1323_s10 }
0x124e   : > { %p18_p3 = scmp.ge.s32.totalorder %s21_s14, 4   ;;  %s1673_s10 = smov %s1327_s11 }
0x124f   : > { %s1674_s11 = smov %s1423_s23  ;;  %s1675_s12 = smov %s1335_s13 }
0x1250   : > { %s1676_s13 = smov %s1678_s17  ;;  %20 = sbr.rel (!%p18_p3) target bundleno = 10 (0xa), region = 106 }
0x1255   :  { %882 = vsyncpa [#allocation5], 1 }
0x1256   :  { %884 = vsyncpa [#allocation5 + $0x1], 1 }
0x1257   :  { %885 = vsyncpa [#allocation8], 1 }
0x1258   :  { %887 = vsyncpa [#allocation8 + $0x1], 1 }
0x1259   :  { %888 = vsyncpa [#allocation6], 1 }
0x125a   :  { %890 = vsyncpa [#allocation6 + $0x1], 1 }

</bundles_post_ra>
